<compile_context>
chip_gen: v5e
topology: v5e:2x2
jax: 0.10.0
libtpu: 0.0.40
codegen_flags: <defaults>
</compile_context>

<pallas_src>
import jax
import jax.numpy as jnp
import numpy as np
from jax.experimental import pallas as pl
from jax.experimental.pallas import tpu as pltpu

MXU_DTYPE = jnp.bfloat16  # MXU inputs; accumulation & elementwise stay f32.


def graphsage_kernel(xs_ref, xj_ref, w1_ref, b1_ref, w2_ref, b2_ref, o_ref):
    """One (batch b, node-tile m) step.

    xs_ref : (TM, Cp)        center-node features (bf16, zero padded)
    xj_ref : (K, TM, Cp)     gathered neighbor features, k-major (bf16)
    w1_ref : (Cp, Cp)        nn1 1x1-conv weight, transposed (bf16)
    b1_ref : (1, Cp)         nn1 bias (f32)
    w2_ref : (2*Cp, Cop)     nn2 weight, rows [0:Cp) act on x, [Cp:2Cp) on xj_max
    b2_ref : (1, Cop)        nn2 bias (f32)
    o_ref  : (TM, Cop)       output (bf16)
    """
    K, TM, Cp = xj_ref.shape

    # ---- nn1: one MXU call over the full (K*TM, Cp) neighbor slab ----------
    # (K, TM, Cp) -> (K*TM, Cp) merges only leading dims; TM is a multiple of
    # 16 so this is a layout-free reshape for bf16.
    xj_flat = xj_ref[...].reshape(K * TM, Cp)
    h = jnp.dot(xj_flat, w1_ref[...], preferred_element_type=jnp.float32)
    h = h.reshape(K, TM, Cp)

    # max over neighbors first, then bias + ReLU once (exact: monotone ops,
    # max_k relu(h_k + b) == relu(max_k h_k + b)).
    xj_max = jnp.max(h, axis=0)                              # (TM, Cp) f32
    xj_max = jnp.maximum(xj_max + b1_ref[...], 0.0)

    # ---- nn2: one full-depth matmul on concat([x, xj_max]) -----------------
    cat = jnp.concatenate([xs_ref[...], xj_max.astype(xs_ref.dtype)], axis=-1)
    y = jnp.dot(cat, w2_ref[...], preferred_element_type=jnp.float32)
    o_ref[...] = jnp.maximum(y + b2_ref[...], 0.0).astype(o_ref.dtype)


def _round_up(a, m):
    return (a + m - 1) // m * m


def _vmem_bytes(TM, K, Cp, Cop):
    """Rough VMEM footprint: double-buffered bf16 tiles + resident weights."""
    dyn = 2 * (K * TM * Cp + TM * Cp + TM * Cop) * 2          # xj, xs, out (x2)
    wts = (Cp * Cp + 2 * Cp * Cop) * 2 + (Cp + Cop) * 4       # weights + biases
    return dyn + wts


def graphsage_forward(x, edge_index, w1, b1, w2, b2, y=None, *, tile_m=512):
    """GraphSAGE forward.

    x          : (B, C, N, 1) float32
    edge_index : (2, B, N, K) int32   (edge_index[0] = neighbor indices)
    w1, b1     : nn1 1x1 conv params, shapes (C, C), (C,)
    w2, b2     : nn2 1x1 conv params, shapes (Cout, 2*C), (Cout,)
    y          : optional (B, C, Ns, 1) gather source (defaults to x)
    returns    : (B, Cout, N, 1) float32
    """
    B, C, N, _ = x.shape
    Cout = w2.shape[0]
    idx = edge_index[0]                                   # (B, N, K)
    K = idx.shape[-1]

    src = x if y is None else y
    Ns = src.shape[2]

    # ---- TPU-friendly sizes: lanes to 128, node rows to multiples of 16 ----
    Cp = _round_up(C, 128)
    Cop = _round_up(Cout, 128)
    TM = min(tile_m, _round_up(N, 16))
    if B == 1:
        # keep >=2 node tiles so the second v7x TensorCore gets work
        while TM > 16 and pl.cdiv(N, TM) < 2:
            TM = max(16, _round_up(TM // 2, 16))
    # v7x VMEM guard (64 MiB/core): keep resident + double-buffered tiles small
    VMEM_BUDGET = 40 * 1024 * 1024
    while TM > 16 and _vmem_bytes(TM, K, Cp, Cop) > VMEM_BUDGET:
        TM = max(16, _round_up(TM // 2, 16))
    Np = _round_up(N, TM)

    # ---- gather with padding fused in: single bf16 stream to the kernel ----
    # channel-pad + cast the source BEFORE the gather, node-pad the (tiny)
    # int32 index, so the gather directly emits the (B, K, Np, Cp) bf16 slab.
    src_nodes = jnp.transpose(src[..., 0], (0, 2, 1))          # (B, Ns, C)
    src_p = jnp.zeros((B, Ns, Cp), MXU_DTYPE).at[:, :, :C].set(
        src_nodes.astype(MXU_DTYPE))                           # (B, Ns, Cp) bf16
    idx_km = jnp.transpose(idx, (0, 2, 1))                     # (B, K, N)
    idx_p = jnp.zeros((B, K, Np), idx.dtype).at[:, :, :N].set(idx_km)
    x_j_p = jax.vmap(lambda s, i: s[i])(src_p, idx_p)          # (B, K, Np, Cp) bf16

    if y is None:
        # center-node slab = node-padded copy of the already channel-padded src
        xs_p = jnp.pad(src_p, ((0, 0), (0, Np - N), (0, 0)))
    else:
        x_nodes = jnp.transpose(x[..., 0], (0, 2, 1))          # (B, N, C)
        xs_p = jnp.zeros((B, Np, Cp), MXU_DTYPE).at[:, :N, :C].set(
            x_nodes.astype(MXU_DTYPE))

    # ---- weights: W1^T, stacked [W2a; W2b] for the full-depth nn2 dot ------
    w1t_p = jnp.zeros((Cp, Cp), MXU_DTYPE).at[:C, :C].set(w1.T.astype(MXU_DTYPE))
    b1_p = jnp.zeros((1, Cp), jnp.float32).at[0, :C].set(b1.astype(jnp.float32))
    w2_p = jnp.zeros((2 * Cp, Cop), MXU_DTYPE)
    w2_p = w2_p.at[:C, :Cout].set(w2[:, :C].T.astype(MXU_DTYPE))          # on x
    w2_p = w2_p.at[Cp:Cp + C, :Cout].set(w2[:, C:].T.astype(MXU_DTYPE))   # on xj_max
    b2_p = jnp.zeros((1, Cop), jnp.float32).at[0, :Cout].set(
        b2.astype(jnp.float32))

    grid = (B, Np // TM)   # both axes parallel (v7x: 2 TensorCores usable)

    out_p = pl.pallas_call(
        graphsage_kernel,
        out_shape=jax.ShapeDtypeStruct((B, Np, Cop), MXU_DTYPE),  # bf16 writeback
        grid=grid,
        in_specs=[
            pl.BlockSpec((None, TM, Cp), lambda b, m: (b, m, 0)),       # x tile
            pl.BlockSpec((None, K, TM, Cp), lambda b, m: (b, 0, m, 0)),  # neighbors
            pl.BlockSpec((Cp, Cp), lambda b, m: (0, 0)),                # W1^T
            pl.BlockSpec((1, Cp), lambda b, m: (0, 0)),                 # b1
            pl.BlockSpec((2 * Cp, Cop), lambda b, m: (0, 0)),           # [W2a;W2b]
            pl.BlockSpec((1, Cop), lambda b, m: (0, 0)),                # b2
        ],
        out_specs=pl.BlockSpec((None, TM, Cop), lambda b, m: (b, m, 0)),
        compiler_params=pltpu.CompilerParams(
            dimension_semantics=("parallel", "parallel"),
            # sized against the 40 MiB tile budget above; stays under v7x's
            # 64 MiB/core VMEM with headroom, fine on v5e/v6e (128 MiB).
            vmem_limit_bytes=48 * 1024 * 1024),
    )(xs_p, x_j_p, w1t_p, b1_p, w2_p, b2_p)

    # Crop padding in bf16, permute the small real output, cast to f32 last.
    out = out_p[:, :N, :Cout]                              # (B, N, Cout) bf16
    out = jnp.transpose(out, (0, 2, 1))[:, :, :, None]     # (B, Cout, N, 1)
    return out.astype(jnp.float32)


def reference_numpy(x, edge_index, w1, b1, w2, b2):
    """Pure numpy replica of the PyTorch GraphSAGE forward (y=None)."""
    x = np.asarray(x, np.float64)              # (B, C, N, 1)
    idx = np.asarray(edge_index)[0]            # (B, N, K)
    w1 = np.asarray(w1, np.float64)
    b1 = np.asarray(b1, np.float64)
    w2 = np.asarray(w2, np.float64)
    b2 = np.asarray(b2, np.float64)
    B, C, N, _ = x.shape
    K = idx.shape[-1]
    xn = x[..., 0]                              # (B, C, N)

    # batched_index_select -> (B, C, N, K)
    x_j = np.zeros((B, C, N, K), np.float64)
    for b in range(B):
        x_j[b] = xn[b][:, idx[b].reshape(-1)].reshape(C, N, K)

    # nn1: 1x1 conv + bias + ReLU
    h = np.einsum('oc,bcnk->bonk', w1, x_j) + b1[None, :, None, None]
    h = np.maximum(h, 0.0)
    # max over neighbors, keepdim
    xj_max = h.max(axis=-1, keepdims=True)      # (B, C, N, 1)
    # nn2 on concat([x, xj_max])
    cat = np.concatenate([x, xj_max], axis=1)   # (B, 2C, N, 1)
    out = np.einsum('oc,bcnk->bonk', w2, cat) + b2[None, :, None, None]
    return np.maximum(out, 0.0)


if __name__ == "__main__":
    B, C, Cout, N, K = 2, 4, 8, 16, 8   # batch, in_ch, out_ch, nodes, neighbors

    key = jax.random.PRNGKey(0)
    kx, ke, k1, k2, k3, k4 = jax.random.split(key, 6)
    x = jax.random.normal(kx, (B, C, N, 1), jnp.float32)
    edge_index = jax.random.randint(ke, (2, B, N, K), 0, N, jnp.int32)
    w1 = jax.random.normal(k1, (C, C), jnp.float32) * 0.3        # nn1 conv (C->C)
    b1 = jax.random.normal(k2, (C,), jnp.float32) * 0.1
    w2 = jax.random.normal(k3, (Cout, 2 * C), jnp.float32) * 0.3  # nn2 conv (2C->Cout)
    b2 = jax.random.normal(k4, (Cout,), jnp.float32) * 0.1

    fn = jax.jit(graphsage_forward)
    out = jax.block_until_ready(fn(x, edge_index, w1, b1, w2, b2))

    ref = reference_numpy(x, edge_index, w1, b1, w2, b2)
    # Tolerance loosened for bf16 MXU inputs / bf16 output (f32 accumulation).
    np.testing.assert_allclose(np.asarray(out), ref, rtol=3e-2, atol=3e-2)
    print("KERNEL_OK")
</pallas_src>

<mosaic_0001>
module attributes {stable_mosaic.version = 11 : i64} {
  func.func @graphsage_kernel(%arg0: i32, %arg1: i32, %arg2: memref<1x16x128xbf16, #tpu.memory_space<vmem>>, %arg3: memref<1x8x16x128xbf16, #tpu.memory_space<vmem>>, %arg4: memref<128x128xbf16, #tpu.memory_space<vmem>>, %arg5: memref<1x128xf32, #tpu.memory_space<vmem>>, %arg6: memref<256x128xbf16, #tpu.memory_space<vmem>>, %arg7: memref<1x128xf32, #tpu.memory_space<vmem>>, %arg8: memref<1x16x128xbf16, #tpu.memory_space<vmem>>) attributes {dimension_semantics = [#tpu.dimension_semantics<parallel>, #tpu.dimension_semantics<parallel>], iteration_bounds = array<i64: 2, 1>, scalar_prefetch = 0 : i64, scratch_operands = 0 : i64, tpu.core_type = #tpu.core_type<tc>, window_params = [{transform_indices = @transform_0, window_bounds = array<i64: 1, 16, 128>}, {transform_indices = @transform_1, window_bounds = array<i64: 1, 8, 16, 128>}, {pipeline_mode = #tpu.pipeline_mode<synchronous>, transform_indices = @transform_2, window_bounds = array<i64: 128, 128>}, {pipeline_mode = #tpu.pipeline_mode<synchronous>, transform_indices = @transform_3, window_bounds = array<i64: 1, 128>}, {pipeline_mode = #tpu.pipeline_mode<synchronous>, transform_indices = @transform_4, window_bounds = array<i64: 256, 128>}, {pipeline_mode = #tpu.pipeline_mode<synchronous>, transform_indices = @transform_5, window_bounds = array<i64: 1, 128>}, {transform_indices = @transform_6, window_bounds = array<i64: 1, 16, 128>}]} {
    %c0 = arith.constant 0 : index
    %c0_0 = arith.constant 0 : index
    %c0_1 = arith.constant 0 : index
    %c0_2 = arith.constant 0 : index
    %0 = vector.load %arg3[%c0, %c0_0, %c0_1, %c0_2] : memref<1x8x16x128xbf16, #tpu.memory_space<vmem>>, vector<1x8x16x128xbf16>
    %1 = vector.shape_cast %0 : vector<1x8x16x128xbf16> to vector<8x16x128xbf16>
    %2 = vector.shape_cast %1 : vector<8x16x128xbf16> to vector<128x128xbf16>
    %c0_3 = arith.constant 0 : index
    %c0_4 = arith.constant 0 : index
    %3 = vector.load %arg4[%c0_3, %c0_4] : memref<128x128xbf16, #tpu.memory_space<vmem>>, vector<128x128xbf16>
    %cst = arith.constant dense<0.000000e+00> : vector<128x128xf32>
    %4 = tpu.matmul %2, %3, %cst {dimension_numbers = #tpu.dot_dimension_numbers<[1], [0], [0], [1], [0, 0, 1, 1], [], []>} : vector<128x128xbf16>, vector<128x128xbf16>, vector<128x128xf32> -> vector<128x128xf32>
    %5 = vector.shape_cast %4 : vector<128x128xf32> to vector<8x16x128xf32>
    %cst_5 = arith.constant dense<0xFF800000> : vector<16x128xf32>
    %6 = vector.multi_reduction <maximumf>, %5, %cst_5 [0] : vector<8x16x128xf32> to vector<16x128xf32>
    %c0_6 = arith.constant 0 : index
    %c0_7 = arith.constant 0 : index
    %7 = vector.load %arg5[%c0_6, %c0_7] : memref<1x128xf32, #tpu.memory_space<vmem>>, vector<1x128xf32>
    %8 = vector.broadcast %7 : vector<1x128xf32> to vector<16x128xf32>
    %9 = arith.addf %6, %8 : vector<16x128xf32>
    %cst_8 = arith.constant 0.000000e+00 : f32
    %10 = vector.broadcast %cst_8 : f32 to vector<16x128xf32>
    %11 = arith.maximumf %9, %10 : vector<16x128xf32>
    %c0_9 = arith.constant 0 : index
    %c0_10 = arith.constant 0 : index
    %c0_11 = arith.constant 0 : index
    %12 = vector.load %arg2[%c0_9, %c0_10, %c0_11] : memref<1x16x128xbf16, #tpu.memory_space<vmem>>, vector<1x16x128xbf16>
    %13 = vector.shape_cast %12 : vector<1x16x128xbf16> to vector<16x128xbf16>
    %14 = arith.truncf %11 : vector<16x128xf32> to vector<16x128xbf16>
    %15 = tpu.concatenate %13, %14 in 1 : vector<16x128xbf16>, vector<16x128xbf16> -> vector<16x256xbf16>
    %c0_12 = arith.constant 0 : index
    %c0_13 = arith.constant 0 : index
    %16 = vector.load %arg6[%c0_12, %c0_13] : memref<256x128xbf16, #tpu.memory_space<vmem>>, vector<256x128xbf16>
    %cst_14 = arith.constant dense<0.000000e+00> : vector<16x128xf32>
    %17 = tpu.matmul %15, %16, %cst_14 {dimension_numbers = #tpu.dot_dimension_numbers<[1], [0], [0], [1], [0, 0, 1, 1], [], []>} : vector<16x256xbf16>, vector<256x128xbf16>, vector<16x128xf32> -> vector<16x128xf32>
    %c0_15 = arith.constant 0 : index
    %c0_16 = arith.constant 0 : index
    %18 = vector.load %arg7[%c0_15, %c0_16] : memref<1x128xf32, #tpu.memory_space<vmem>>, vector<1x128xf32>
    %19 = vector.broadcast %18 : vector<1x128xf32> to vector<16x128xf32>
    %20 = arith.addf %17, %19 : vector<16x128xf32>
    %cst_17 = arith.constant 0.000000e+00 : f32
    %21 = vector.broadcast %cst_17 : f32 to vector<16x128xf32>
    %22 = arith.maximumf %20, %21 : vector<16x128xf32>
    %23 = arith.truncf %22 : vector<16x128xf32> to vector<16x128xbf16>
    %c0_18 = arith.constant 0 : index
    %c0_19 = arith.constant 0 : index
    %c0_20 = arith.constant 0 : index
    %24 = vector.load %arg8[%c0_18, %c0_19, %c0_20] : memref<1x16x128xbf16, #tpu.memory_space<vmem>>, vector<1x16x128xbf16>
    %25 = vector.shape_cast %24 : vector<1x16x128xbf16> to vector<16x128xbf16>
    %26 = vector.shape_cast %23 : vector<16x128xbf16> to vector<1x16x128xbf16>
    tpu.vector_store %arg8[%c0_18, %c0_19, %c0_20], %26 {strides = array<i32>} : memref<1x16x128xbf16, #tpu.memory_space<vmem>>, vector<1x16x128xbf16>,
    return
  }
  func.func @transform_0(%arg0: i32, %arg1: i32) -> (i32, i32, i32) {
    %c0_i32 = arith.constant 0 : i32
    %c0_i32_0 = arith.constant 0 : i32
    return %arg0, %arg1, %c0_i32 : i32, i32, i32
  }
  func.func @transform_1(%arg0: i32, %arg1: i32) -> (i32, i32, i32, i32) {
    %c0_i32 = arith.constant 0 : i32
    %c0_i32_0 = arith.constant 0 : i32
    %c0_i32_1 = arith.constant 0 : i32
    return %arg0, %c0_i32, %arg1, %c0_i32_0 : i32, i32, i32, i32
  }
  func.func @transform_2(%arg0: i32, %arg1: i32) -> (i32, i32) {
    %c0_i32 = arith.constant 0 : i32
    %c0_i32_0 = arith.constant 0 : i32
    %c0_i32_1 = arith.constant 0 : i32
    return %c0_i32, %c0_i32_0 : i32, i32
  }
  func.func @transform_3(%arg0: i32, %arg1: i32) -> (i32, i32) {
    %c0_i32 = arith.constant 0 : i32
    %c0_i32_0 = arith.constant 0 : i32
    %c0_i32_1 = arith.constant 0 : i32
    return %c0_i32, %c0_i32_0 : i32, i32
  }
  func.func @transform_4(%arg0: i32, %arg1: i32) -> (i32, i32) {
    %c0_i32 = arith.constant 0 : i32
    %c0_i32_0 = arith.constant 0 : i32
    %c0_i32_1 = arith.constant 0 : i32
    return %c0_i32, %c0_i32_0 : i32, i32
  }
  func.func @transform_5(%arg0: i32, %arg1: i32) -> (i32, i32) {
    %c0_i32 = arith.constant 0 : i32
    %c0_i32_0 = arith.constant 0 : i32
    %c0_i32_1 = arith.constant 0 : i32
    return %c0_i32, %c0_i32_0 : i32, i32
  }
  func.func @transform_6(%arg0: i32, %arg1: i32) -> (i32, i32, i32) {
    %c0_i32 = arith.constant 0 : i32
    %c0_i32_0 = arith.constant 0 : i32
    return %arg0, %arg1, %c0_i32 : i32, i32, i32
  }
}

</mosaic_0001>

<bundles_post_ra>
// kernel: graphsage_forward.1
= control target key start
LH: loop header
LB: loop body
LE: loop exit
PB: predicated region body
PF: predicated region fallthrough
CT: control target
= control target key end

     0   :  { %s1100_s21 = smov 0   ;;  %s1102_s22 = smov 0   ;;  %s1226_s0 = inlined_call_operand.vmem [shape: bf16[2,16,128], index: 0, kind: input, shape index: {}]   ;;  %s1227_s1 = inlined_call_operand.vmem [shape: bf16[2,8,16,128], index: 1, kind: input, shape index: {}]   ;;  %s1228_s2 = inlined_call_operand.vmem [shape: bf16[128,128], index: 2, kind: input, shape index: {}]   ;;  %s1229_s3 = inlined_call_operand.vmem [shape: f32[1,128], index: 3, kind: input, shape index: {}]   ;;  %s1230_s4 = inlined_call_operand.vmem [shape: bf16[256,128], index: 4, kind: input, shape index: {}]   ;;  %s1231_s5 = inlined_call_operand.vmem [shape: f32[1,128], index: 5, kind: input, shape index: {}]   ;;  %s1232_s6 = inlined_call_operand.vmem [shape: bf16[2,16,128], index: 6, kind: output, shape index: {}]  }
   0x1   :  { %s1104_s23 = smov 0  }
   0x2 LB: > { %s28_s24 = sadd.s32 1, %s1059_s22  ;;  %p817_p0 = scmp.ge.s32.totalorder %s1063_s23, 1  ;;  %s1063_s23 = sphi %s1104_s23, %s16_s23   ;;  %s1059_s22 = sphi %s1102_s22, %s1234_s22   ;;  %s1055_s21 = sphi %s1100_s21, %s1233_s21  }
   0x3   : > { %p30_p1 = scmp.ge.s32.totalorder %s28_s24, 2  ;;  %p250_p2 = scmp.lt.s32.totalorder %s1063_s23, 3 }
   0x5   : > { %s1236_s24 = smov (%p30_p1, %s28_s24), 0  ;;  %p251_p3 = pnand %p817_p0, %p250_p2 }
   0x6   : > { %p298_p4 = scmp.lt.s32.totalorder (!%p251_p3), %s1055_s21, 1 }
   0x7   : > { %254 = sbr.rel (%p251_p3) target bundleno = 377 (0x179), region = 44 }
   0xc   : > { %v976_v0 = vld [vmem:[%s1228_s2 + $0x38] sm:$0xff]  ;;  %v975_v1 = vld [vmem:[%s1228_s2 + $0x30] sm:$0xff]  ;;  %v974_v2 = vld [vmem:[%s1228_s2 + $0x28] sm:$0xff]  ;;  %s1238_s21 = smov (!%p298_p4, %s1055_s21), 1 }
   0xd   : > { %455 = vmatpush.bf16.msra.mxu0 %v976_v0  ;;  %1000 = vmatpush.bf16.msra.mxu3 %v976_v0  ;;  %v973_v3 = vld [vmem:[%s1228_s2 + $0x20] sm:$0xff]  ;;  %v972_v4 = vld [vmem:[%s1228_s2 + $0x18] sm:$0xff]  ;;  %v971_v5 = vld [vmem:[%s1228_s2 + $0x10] sm:$0xff]  ;;  %s959_s15 = sshll.u32 %s1238_s21, 6  ;;  %s958_s27 = sshll.u32 %s1238_s21, 3 }
   0xe   : > { %999 = vmatpush.bf16.msra.mxu1 %v976_v0  ;;  %v970_v6 = vld [vmem:[%s1228_s2 + $0x8] sm:$0xff]  ;;  %v969_v7 = vld [vmem:[%s1228_s2] sm:$0xff]  ;;  %s315_s20 = scalar_lea.vmem %s1227_s1, %s959_s15  ;;  %v985_v16 = vld [vmem:[%s1230_s4 + $0x38] sm:$0xff]  ;;  %s305_s10 = scalar_lea.vmem %s1226_s0, %s958_s27 }
   0xf   : > { %v961_v8 = vld [vmem:[%s315_s20] sm:$0xff]  ;;  %v966_v9 = vld [vmem:[%s315_s20 + $0x28] sm:$0xff]  ;;  %v964_v10 = vld [vmem:[%s315_s20 + $0x18] sm:$0xff]  ;;  %s325_s28 = scalar_lea.vmem %s1232_s6, %s958_s27 }
  0x10   : > { %v962_v11 = vld [vmem:[%s315_s20 + $0x8] sm:$0xff]  ;;  %v967_v12 = vld [vmem:[%s315_s20 + $0x30] sm:$0xff]  ;;  %v965_v13 = vld [vmem:[%s315_s20 + $0x20] sm:$0xff] }
  0x11   : > { %456 = vmatpush.bf16.msra.mxu0 %v975_v1  ;;  %1002 = vmatpush.bf16.msra.mxu3 %v975_v1  ;;  %v963_v14 = vld [vmem:[%s315_s20 + $0x10] sm:$0xff]  ;;  %v968_v15 = vld [vmem:[%s315_s20 + $0x38] sm:$0xff]  ;;  %v983_v20 = vld [vmem:[%s1230_s4 + $0x28] sm:$0xff] }
  0x12   : > { %1001 = vmatpush.bf16.msra.mxu1 %v975_v1  ;;  %v984_v17 = vld [vmem:[%s1230_s4 + $0x30] sm:$0xff]  ;;  %v993_v18 = vld [vmem:[%s1230_s4 + $0x78] sm:$0xff]  ;;  %v982_v22 = vld [vmem:[%s1230_s4 + $0x20] sm:$0xff] }
  0x13   : > { %688 = vmatpush.bf16.msra.mxu2 %v993_v18  ;;  %v992_v21 = vld [vmem:[%s1230_s4 + $0x70] sm:$0xff]  ;;  %v991_v23 = vld [vmem:[%s1230_s4 + $0x68] sm:$0xff]  ;;  %v981_v26 = vld [vmem:[%s1230_s4 + $0x18] sm:$0xff] }
  0x14   : > { %v990_v27 = vld [vmem:[%s1230_s4 + $0x60] sm:$0xff]  ;;  %v980_v29 = vld [vmem:[%s1230_s4 + $0x10] sm:$0xff]  ;;  %v989_v30 = vld [vmem:[%s1230_s4 + $0x58] sm:$0xff] }
  0x15   : > { %457 = vmatpush.bf16.msra.mxu0 %v974_v2  ;;  %1004 = vmatpush.bf16.msra.mxu3 %v974_v2  ;;  %v979_v33 = vld [vmem:[%s1230_s4 + $0x8] sm:$0xff]  ;;  %v988_v34 = vld [vmem:[%s1230_s4 + $0x50] sm:$0xff]  ;;  %v978_v35 = vld [vmem:[%s1230_s4] sm:$0xff] }
  0x16   : > { %1003 = vmatpush.bf16.msra.mxu1 %v974_v2  ;;  %v987_v36 = vld [vmem:[%s1230_s4 + $0x48] sm:$0xff]  ;;  %v977_v37 = vld [vmem:[%s305_s10] sm:$0xff] }
  0x17   : > { %689 = vmatpush.bf16.msra.mxu2 %v992_v21  ;;  %v986_v40 = vld [vmem:[%s1230_s4 + $0x40] sm:$0xff] }
  0x18   : > { %v1039_v55 = vld [vmem:[%s1229_s3] ss:$0 sm:$0xff] }
  0x19   : > { %458 = vmatpush.bf16.msra.mxu0 %v973_v3  ;;  %1006 = vmatpush.bf16.msra.mxu3 %v973_v3 }
  0x1a   : > { %1005 = vmatpush.bf16.msra.mxu1 %v973_v3 }
  0x1b   : > { %690 = vmatpush.bf16.msra.mxu2 %v991_v23 }
  0x1d   : > { %459 = vmatpush.bf16.msra.mxu0 %v972_v4  ;;  %1008 = vmatpush.bf16.msra.mxu3 %v972_v4 }
  0x1e   : > { %1007 = vmatpush.bf16.msra.mxu1 %v972_v4 }
  0x1f   : > { %691 = vmatpush.bf16.msra.mxu2 %v990_v27 }
  0x21   : > { %460 = vmatpush.bf16.msra.mxu0 %v971_v5  ;;  %1010 = vmatpush.bf16.msra.mxu3 %v971_v5 }
  0x22   : > { %1009 = vmatpush.bf16.msra.mxu1 %v971_v5 }
  0x23   : > { %692 = vmatpush.bf16.msra.mxu2 %v989_v30 }
  0x25   : > { %461 = vmatpush.bf16.msra.mxu0 %v970_v6  ;;  %1012 = vmatpush.bf16.msra.mxu3 %v970_v6 }
  0x26   : > { %1011 = vmatpush.bf16.msra.mxu1 %v970_v6 }
  0x27   : > { %693 = vmatpush.bf16.msra.mxu2 %v988_v34 }
  0x29   : > { %462 = vmatpush.bf16.msra.mxu0 %v969_v7  ;;  %1014 = vmatpush.bf16.msra.mxu3 %v969_v7 }
  0x2a   : > { %1013 = vmatpush.bf16.msra.mxu1 %v969_v7 }
  0x2b   : > { %694 = vmatpush.bf16.msra.mxu2 %v987_v36 }
  0x2c   : > { %463 = vmatmul.bf16.vlgmr.msra.gmra.mxu0 %v961_v8  ;;  %488 = vmatmul.bf16.vlgmr.msra.gmra.mxu3 %v966_v9 }
  0x2d   : > { %478 = vmatmul.bf16.vlgmr.msra.gmra.mxu1 %v964_v10  ;;  %v1040_v10 = vld [vmem:[%s1231_s5] ss:$0 sm:$0xff] }
  0x2e   : > { %674 = vmatpush.bf16.msrb.mxu1 %v985_v16 }
  0x2f   : > { %695 = vmatpush.bf16.msra.mxu2 %v986_v40 }
  0x32   : > { %675 = vmatpush.bf16.msrb.mxu1 %v984_v17 }
  0x36   : > { %676 = vmatpush.bf16.msrb.mxu1 %v983_v20 }
  0x3a   : > { %677 = vmatpush.bf16.msrb.mxu1 %v982_v22 }
  0x3c   : > { %468 = vmatmul.bf16.gmra.mxu0 %v962_v11  ;;  %493 = vmatmul.bf16.gmra.mxu3 %v967_v12 }
  0x3d   : > { %483 = vmatmul.bf16.gmra.mxu1 %v965_v13 }
  0x3e   : > { %678 = vmatpush.bf16.msrb.mxu1 %v981_v26 }
  0x42   : > { %679 = vmatpush.bf16.msrb.mxu1 %v980_v29 }
  0x46   : > { %680 = vmatpush.bf16.msrb.mxu1 %v979_v33 }
  0x4a   : > { %681 = vmatpush.bf16.msrb.mxu1 %v978_v35 }
  0x4c   : > { %473 = vmatmul.bf16.gmra.mxu0 %v963_v14  ;;  %498 = vmatmul.bf16.gmra.mxu3 %v968_v15 }
  0x4d   : > { %682 = vmatmul.bf16.vlgmr.msrb.gmra.mxu1 %v977_v37 }
  0xa9   : > { %v464_v19 = vpop.f32.mrf.mxu0 }
  0xaa   : > { %v479_v28 = vpop.f32.mrf.mxu1 }
  0xaf   : > { %v489_v24 = vpop.f32.mrf.mxu3 }
  0xb1   : > { %v466_v25 = vpop.f32.mrf.mxu0 }
  0xb2   : > { %v481_v38 = vpop.f32.mrf.mxu1 }
  0xb7   : > { %v491_v31 = vpop.f32.mrf.mxu3 }
  0xb9   : > { %v469_v32 = vpop.f32.mrf.mxu0 }
  0xba   : > { %v484_v43 = vpop.f32.mrf.mxu1  ;;  %v505_v45 = vmax.f32 %v469_v32, %v479_v28 }
  0xbc   : > { %v507_v48 = vmax.f32 %v505_v45, %v489_v24 }
  0xbf   : > { %v494_v39 = vpop.f32.mrf.mxu3 }
  0xc1   : > { %v471_v41 = vpop.f32.mrf.mxu0 }
  0xc2   : > { %v512_v53 = vmax.f32 %v471_v41, %v481_v38  ;;  %v486_v57 = vpop.f32.mrf.mxu1 }
  0xc4   : > { %v514_v60 = vmax.f32 %v512_v53, %v491_v31 }
  0xc7   : > { %v496_v42 = vpop.f32.mrf.mxu3 }
  0xc9   : > { %v474_v44 = vpop.f32.mrf.mxu0 }
  0xca   : > { %v504_v46 = vmax.f32 %v464_v19, %v474_v44  ;;  %v683_v9 = vpop.f32.mrf.mxu1 }
  0xcb   : > { %v684_v12 = vadd.f32 %v1040_v10, %v683_v9 }
  0xcc   : > { %v506_v47 = vmax.f32 %v504_v46, %v484_v43 }
  0xce   : > { %v508_v50 = vmax.f32 %v506_v47, %v494_v39 }
  0xcf   : > { %v499_v49 = vpop.f32.mrf.mxu3 }
  0xd0   : > { %v509_v51 = vmax.f32 %v507_v48, %v499_v49 }
  0xd1   : > { %v476_v52 = vpop.f32.mrf.mxu0 }
  0xd2   : > { %v510_v54 = vmax.f32 %v508_v50, %v509_v51  ;;  %v511_v56 = vmax.f32 %v466_v25, %v476_v52  ;;  %v685_v13 = vpop.f32.mrf.mxu1 }
  0xd3   : > { %v686_v14 = vadd.f32 %v1040_v10, %v685_v13 }
  0xd4   : > { %v513_v58 = vmax.f32 %v511_v56, %v486_v57  ;;  %v522_v59 = vadd.f32 %v1039_v55, %v510_v54 }
  0xd6   : > { %v515_v62 = vmax.f32 %v513_v58, %v496_v42  ;;  %v524_v1 = vmax.f32 %v522_v59, 0.0 }
  0xd7   : > { %v501_v61 = vpop.f32.mrf.mxu3 }
  0xd8   : > { %v516_v63 = vmax.f32 %v514_v60, %v501_v61  ;;  %v528_v4 = vpack.c.bf16 %v524_v1, %v524_v1 }
  0xda   : > { %v517_v0 = vmax.f32 %v515_v62, %v516_v63  ;;  %v538_v6 = vunpack.c.l.b16 %v528_v4 }
  0xdc   : > { %v523_v2 = vadd.f32 %v1039_v55, %v517_v0 }
  0xde   : > { %v525_v3 = vmax.f32 %v523_v2, 0.0 }
  0xe0   : > { %v529_v5 = vpack.c.bf16 %v525_v3, %v525_v3 }
  0xe2   : > { %v539_v7 = vunpack.c.l.b16 %v529_v5 }
  0xe4   : > { %v540_v8 = vpack.c.b16 %v539_v7, %v538_v6 }
  0xe6   : > { %696 = vmatmul.bf16.vlgmr.msra.gmra.mxu2 %v540_v8 }
 0x169   : > { %v697_v11 = vpop.f32.mrf.mxu2 }
 0x16a   : > { %v698_v15 = vadd.f32 %v697_v11, %v684_v12 }
 0x16c   : > { %v702_v18 = vmax.f32 %v698_v15, 0.0 }
 0x171   : > { %v699_v16 = vpop.f32.mrf.mxu2 }
 0x172   : > { %v700_v17 = vadd.f32 %v699_v16, %v686_v14 }
 0x174   : > { %v703_v19 = vmax.f32 %v700_v17, 0.0 }
 0x176   : > { %v997_v20 = vpack.c.bf16 %v703_v19, %v702_v18 }
 0x178   : > { %998 = vst [vmem:[%s325_s28] sm:$0xff] %v997_v20  }
 0x179 PF: > { %s16_s23 = sadd.s32 1, %s1063_s23   ;;  %s1233_s21 = smov %s1059_s22 }
 0x17a   : > { %p13_p5 = scmp.ge.s32.totalorder %s16_s23, 4   ;;  %s1234_s22 = smov %s1236_s24 }
 0x17c   :  { %15 = sbr.rel (!%p13_p5) target bundleno = 2 (0x2), region = 77 }

</bundles_post_ra>
